<compile_context>
chip_gen: v6e
topology: v6e:2x2x1
jax: 0.10.0
libtpu: 0.0.40
codegen_flags: <defaults>
</compile_context>

<pallas_src>
import math
import functools

import jax
import jax.numpy as jnp
from jax import lax
from jax.experimental import pallas as pl
from jax.experimental.pallas import tpu as pltpu

_INV_SQRT2 = 1.0 / math.sqrt(2.0)


def _transform_kernel(x_ref, wt_ref, b_ref, gamma_ref, beta_ref, o_ref, *, eps, cm):
    """One (TM, H) token tile: out = LayerNorm(gelu_erf(x @ W^T + b)).

    x_ref:     (TM, H) f32   activations (cast to bf16 just before the dot)
    wt_ref:    (H, H)  bf16  dense weight, PRE-TRANSPOSED to (in, out) layout
    b_ref:     (1, H)  f32   dense bias
    gamma_ref: (1, H)  f32   LayerNorm scale
    beta_ref:  (1, H)  f32   LayerNorm shift
    o_ref:     (TM, H) bf16  output
    """
    wt = wt_ref[...]
    b = b_ref[...]
    gamma = gamma_ref[...]
    beta = beta_ref[...]

    tm = o_ref.shape[0]
    nc = tm // cm                       # static sub-chunk count (>= 1)

    def chunk(j, carry):
        r0 = pl.multiple_of(j * cm, cm)
        # Cast to bf16 in-kernel (cheap VPU op, hidden under the matmul).
        xj = x_ref[pl.ds(r0, cm), :].astype(jnp.bfloat16)
        # Dense: plain MXU matmul against the pre-transposed weight (no in-kernel
        # transpose), f32 accumulation.
        y = jnp.dot(xj, wt, preferred_element_type=jnp.float32) + b
        # erf-GELU (original BERT activation), computed in f32.
        y = y * 0.5 * (1.0 + lax.erf(y * _INV_SQRT2))
        # Single-pass LayerNorm stats over the hidden axis.
        mean = jnp.mean(y, axis=-1, keepdims=True)
        msq = jnp.mean(y * y, axis=-1, keepdims=True)
        var = jnp.maximum(msq - mean * mean, 0.0)
        scale = lax.rsqrt(var + eps)
        o_ref[pl.ds(r0, cm), :] = ((y - mean) * (scale * gamma) + beta).astype(o_ref.dtype)
        return carry

    lax.fori_loop(0, nc, chunk, 0, unroll=True)


def prepare_params(weight, bias, gamma, beta):
    """One-time parameter prep (do at model-load time, NOT per forward):
    torch-layout (out, in) dense weight -> (in, out) bf16 for a transpose-free
    MXU dot; bias / LN params to f32 row vectors."""
    wt = jnp.asarray(weight).T.astype(jnp.bfloat16)
    b = jnp.asarray(bias).reshape(1, -1).astype(jnp.float32)
    g = jnp.asarray(gamma).reshape(1, -1).astype(jnp.float32)
    be = jnp.asarray(beta).reshape(1, -1).astype(jnp.float32)
    return wt, b, g, be


def _pick_tm(M, block_m):
    if M <= 8:
        return M                        # tiny: single full-extent block
    tm = min(block_m, M)
    tm -= tm % 8                        # sublane multiple
    if tm >= 256:
        tm -= tm % 128                  # MXU-friendly for larger tiles
    if pl.cdiv(M, tm) < 2:              # ensure >=2 grid steps (v7x megacore)
        half = -(-M // 2)
        half = -(-half // 8) * 8
        tm = min(tm, half)
    return max(tm, 8)


def _pick_cm(tm):
    # 2-4 row sub-chunks so the MXU of chunk j+1 overlaps the GELU+LN epilogue
    # of chunk j; chunks must be sublane (8) multiples.
    for nc in (4, 2):
        if tm % nc == 0 and (tm // nc) % 8 == 0:
            return tm // nc
    return tm


def _vmem_limit_bytes(needed):
    try:
        cap = int(pltpu.get_tpu_info().vmem_capacity_bytes)
    except Exception:
        cap = 64 * 1024 * 1024          # conservative fallback (v7x per-TC)
    ceiling = int(cap * 0.7)            # ~45 MiB on v7x, ~90 MiB on v5e/v6e
    want = max(int(1.5 * needed), 32 * 1024 * 1024)
    return min(want, ceiling)


def bert_prediction_head_transform(x, wt, bias2, gamma2, beta2, *, block_m=512,
                                   eps=1e-12, out_dtype=jnp.bfloat16):
    """x: (B, S, H) float.  wt: (H, H) bf16 PRE-TRANSPOSED (in, out) from
    prepare_params.  bias2/gamma2/beta2: (1, H) f32.  Returns (B, S, H) out_dtype."""
    B, S, H = x.shape
    M = B * S
    x2 = x.reshape(M, H)                # collapse leading dims; no dtype copy

    tm = _pick_tm(M, block_m)
    cm = _pick_cm(tm)
    grid = (pl.cdiv(M, tm),)
    # NOTE: if M % tm != 0, the last block's extra rows are read OOB-padded and the
    # corresponding output rows are masked — benign since rows are independent.

    x_bytes = x2.dtype.itemsize
    o_bytes = jnp.dtype(out_dtype).itemsize
    w_bytes = wt.dtype.itemsize
    needed = (H * H * w_bytes                 # resident weight
              + 2 * tm * H * x_bytes          # double-buffered input tile
              + 2 * tm * H * o_bytes          # double-buffered output tile
              + 3 * H * 4                     # bias / gamma / beta
              + 4 * cm * H * 4)               # f32 per-chunk intermediates
    vmem_limit = _vmem_limit_bytes(needed)

    cost = pl.CostEstimate(
        flops=2 * M * H * H,
        transcendentals=M * H,
        bytes_accessed=M * H * x_bytes + H * H * w_bytes + M * H * o_bytes + 3 * H * 4,
    )

    out = pl.pallas_call(
        functools.partial(_transform_kernel, eps=eps, cm=cm),
        out_shape=jax.ShapeDtypeStruct((M, H), out_dtype),
        grid_spec=pltpu.PrefetchScalarGridSpec(
            num_scalar_prefetch=0,
            grid=grid,
            in_specs=[
                pl.BlockSpec((tm, H), lambda i: (i, 0)),   # token tile (pipelined)
                pl.BlockSpec((H, H), lambda i: (0, 0)),    # weight: VMEM-resident
                pl.BlockSpec((1, H), lambda i: (0, 0)),    # bias
                pl.BlockSpec((1, H), lambda i: (0, 0)),    # gamma
                pl.BlockSpec((1, H), lambda i: (0, 0)),    # beta
            ],
            out_specs=pl.BlockSpec((tm, H), lambda i: (i, 0)),
        ),
        compiler_params=pltpu.CompilerParams(
            dimension_semantics=("parallel",),             # row tiles independent
            vmem_limit_bytes=vmem_limit,
        ),
        cost_estimate=cost,
    )(x2, wt, bias2, gamma2, beta2)
    return out.reshape(B, S, H)


def _reference(x, weight, bias, gamma, beta, eps=1e-12):
    y = jnp.einsum("bsh,oh->bso", x, weight) + bias
    y = y * 0.5 * (1.0 + lax.erf(y * _INV_SQRT2))
    mean = jnp.mean(y, axis=-1, keepdims=True)
    var = jnp.mean((y - mean) ** 2, axis=-1, keepdims=True)
    return (y - mean) * lax.rsqrt(var + eps) * gamma + beta


if __name__ == "__main__":
    B, S, H = 2, 8, 32  # small shapes: batch=2, seq=8, hidden=32
    key = jax.random.PRNGKey(0)
    kx, kw, kb, kg, kbe = jax.random.split(key, 5)

    x = jax.random.normal(kx, (B, S, H), dtype=jnp.float32)
    # deterministic param init (nn.Linear-like scale)
    weight = jax.random.normal(kw, (H, H), dtype=jnp.float32) * (1.0 / math.sqrt(H))
    bias = jax.random.normal(kb, (H,), dtype=jnp.float32) * 0.02
    gamma = 1.0 + 0.01 * jax.random.normal(kg, (H,), dtype=jnp.float32)
    beta = 0.01 * jax.random.normal(kbe, (H,), dtype=jnp.float32)

    # One-time param prep (transpose + bf16 cast) hoisted out of the forward path.
    wt, b2, g2, be2 = prepare_params(weight, bias, gamma, beta)

    out = bert_prediction_head_transform(x, wt, b2, g2, be2)
    out = jax.block_until_ready(out)

    ref = _reference(x, weight, bias, gamma, beta)
    assert out.shape == (B, S, H)
    assert out.dtype == jnp.bfloat16
    # bf16 MXU operands + bf16 output -> loosened tolerance vs f32 reference.
    assert jnp.allclose(out.astype(jnp.float32), ref, atol=5e-2, rtol=5e-2), \
        "mismatch vs reference"

    print("KERNEL_OK")
</pallas_src>

<mosaic_0001>
module attributes {stable_mosaic.version = 11 : i64} {
  func.func @_transform_kernel(%arg0: i32, %arg1: memref<8x32xf32, #tpu.memory_space<vmem>>, %arg2: memref<32x32xbf16, #tpu.memory_space<vmem>>, %arg3: memref<1x32xf32, #tpu.memory_space<vmem>>, %arg4: memref<1x32xf32, #tpu.memory_space<vmem>>, %arg5: memref<1x32xf32, #tpu.memory_space<vmem>>, %arg6: memref<8x32xbf16, #tpu.memory_space<vmem>>) attributes {dimension_semantics = [#tpu.dimension_semantics<parallel>], iteration_bounds = array<i64: 2>, scalar_prefetch = 0 : i64, scratch_operands = 0 : i64, tpu.core_type = #tpu.core_type<tc>, window_params = [{transform_indices = @transform_0, window_bounds = array<i64: 8, 32>}, {pipeline_mode = #tpu.pipeline_mode<synchronous>, transform_indices = @transform_1, window_bounds = array<i64: 32, 32>}, {pipeline_mode = #tpu.pipeline_mode<synchronous>, transform_indices = @transform_2, window_bounds = array<i64: 1, 32>}, {pipeline_mode = #tpu.pipeline_mode<synchronous>, transform_indices = @transform_3, window_bounds = array<i64: 1, 32>}, {pipeline_mode = #tpu.pipeline_mode<synchronous>, transform_indices = @transform_4, window_bounds = array<i64: 1, 32>}, {transform_indices = @transform_5, window_bounds = array<i64: 8, 32>}]} {
    %c0 = arith.constant 0 : index
    %c0_0 = arith.constant 0 : index
    %0 = vector.load %arg2[%c0, %c0_0] : memref<32x32xbf16, #tpu.memory_space<vmem>>, vector<32x32xbf16>
    %c0_1 = arith.constant 0 : index
    %c0_2 = arith.constant 0 : index
    %1 = vector.load %arg3[%c0_1, %c0_2] : memref<1x32xf32, #tpu.memory_space<vmem>>, vector<1x32xf32>
    %c0_3 = arith.constant 0 : index
    %c0_4 = arith.constant 0 : index
    %2 = vector.load %arg4[%c0_3, %c0_4] : memref<1x32xf32, #tpu.memory_space<vmem>>, vector<1x32xf32>
    %c0_5 = arith.constant 0 : index
    %c0_6 = arith.constant 0 : index
    %3 = vector.load %arg5[%c0_5, %c0_6] : memref<1x32xf32, #tpu.memory_space<vmem>>, vector<1x32xf32>
    %c0_i32 = arith.constant 0 : i32
    %c8_i32 = arith.constant 8 : i32
    %4 = arith.muli %c0_i32, %c8_i32 : i32
    %5 = tpu.assume_multiple %4, 8 : i32
    %6 = arith.index_cast %5 : i32 to index
    %c0_7 = arith.constant 0 : index
    %7 = vector.load %arg1[%6, %c0_7] : memref<8x32xf32, #tpu.memory_space<vmem>>, vector<8x32xf32>
    %8 = arith.truncf %7 : vector<8x32xf32> to vector<8x32xbf16>
    %cst = arith.constant dense<0.000000e+00> : vector<8x32xf32>
    %9 = tpu.matmul %8, %0, %cst {dimension_numbers = #tpu.dot_dimension_numbers<[1], [0], [0], [1], [0, 0, 1, 1], [], []>} : vector<8x32xbf16>, vector<32x32xbf16>, vector<8x32xf32> -> vector<8x32xf32>
    %10 = vector.broadcast %1 : vector<1x32xf32> to vector<8x32xf32>
    %11 = arith.addf %9, %10 : vector<8x32xf32>
    %cst_8 = arith.constant 5.000000e-01 : f32
    %12 = vector.broadcast %cst_8 : f32 to vector<8x32xf32>
    %13 = arith.mulf %11, %12 : vector<8x32xf32>
    %cst_9 = arith.constant 0.707106769 : f32
    %14 = vector.broadcast %cst_9 : f32 to vector<8x32xf32>
    %15 = arith.mulf %11, %14 : vector<8x32xf32>
    %16 = math.erf %15 : vector<8x32xf32>
    %cst_10 = arith.constant 1.000000e+00 : f32
    %17 = vector.broadcast %cst_10 : f32 to vector<8x32xf32>
    %18 = arith.addf %17, %16 : vector<8x32xf32>
    %19 = arith.mulf %13, %18 : vector<8x32xf32>
    %cst_11 = arith.constant dense<0.000000e+00> : vector<8xf32>
    %20 = vector.multi_reduction <add>, %19, %cst_11 [1] : vector<8x32xf32> to vector<8xf32>
    %21 = vector.shape_cast %20 : vector<8xf32> to vector<8x1xf32>
    %cst_12 = arith.constant 3.200000e+01 : f32
    %22 = vector.broadcast %cst_12 : f32 to vector<8x1xf32>
    %23 = arith.divf %21, %22 : vector<8x1xf32>
    %24 = arith.mulf %19, %19 : vector<8x32xf32>
    %cst_13 = arith.constant dense<0.000000e+00> : vector<8xf32>
    %25 = vector.multi_reduction <add>, %24, %cst_13 [1] : vector<8x32xf32> to vector<8xf32>
    %26 = vector.shape_cast %25 : vector<8xf32> to vector<8x1xf32>
    %cst_14 = arith.constant 3.200000e+01 : f32
    %27 = vector.broadcast %cst_14 : f32 to vector<8x1xf32>
    %28 = arith.divf %26, %27 : vector<8x1xf32>
    %29 = arith.mulf %23, %23 : vector<8x1xf32>
    %30 = arith.subf %28, %29 : vector<8x1xf32>
    %cst_15 = arith.constant 0.000000e+00 : f32
    %31 = vector.broadcast %cst_15 : f32 to vector<8x1xf32>
    %32 = arith.maximumf %30, %31 : vector<8x1xf32>
    %cst_16 = arith.constant 9.99999996E-13 : f32
    %33 = vector.broadcast %cst_16 : f32 to vector<8x1xf32>
    %34 = arith.addf %32, %33 : vector<8x1xf32>
    %35 = math.rsqrt %34 : vector<8x1xf32>
    %36 = vector.broadcast %23 : vector<8x1xf32> to vector<8x32xf32>
    %37 = arith.subf %19, %36 : vector<8x32xf32>
    %38 = vector.broadcast %35 : vector<8x1xf32> to vector<8x32xf32>
    %39 = vector.broadcast %2 : vector<1x32xf32> to vector<8x32xf32>
    %40 = arith.mulf %38, %39 : vector<8x32xf32>
    %41 = arith.mulf %37, %40 : vector<8x32xf32>
    %42 = vector.broadcast %3 : vector<1x32xf32> to vector<8x32xf32>
    %43 = arith.addf %41, %42 : vector<8x32xf32>
    %44 = arith.truncf %43 : vector<8x32xf32> to vector<8x32xbf16>
    %45 = arith.index_cast %5 : i32 to index
    %c0_17 = arith.constant 0 : index
    %46 = vector.load %arg6[%45, %c0_17] : memref<8x32xbf16, #tpu.memory_space<vmem>>, vector<8x32xbf16>
    tpu.vector_store %arg6[%45, %c0_17], %44 {strides = array<i32>} : memref<8x32xbf16, #tpu.memory_space<vmem>>, vector<8x32xbf16>,
    %c1_i32 = arith.constant 1 : i32
    return
  }
  func.func @transform_0(%arg0: i32) -> (i32, i32) {
    %c0_i32 = arith.constant 0 : i32
    %c0_i32_0 = arith.constant 0 : i32
    return %arg0, %c0_i32 : i32, i32
  }
  func.func @transform_1(%arg0: i32) -> (i32, i32) {
    %c0_i32 = arith.constant 0 : i32
    %c0_i32_0 = arith.constant 0 : i32
    %c0_i32_1 = arith.constant 0 : i32
    return %c0_i32, %c0_i32_0 : i32, i32
  }
  func.func @transform_2(%arg0: i32) -> (i32, i32) {
    %c0_i32 = arith.constant 0 : i32
    %c0_i32_0 = arith.constant 0 : i32
    %c0_i32_1 = arith.constant 0 : i32
    return %c0_i32, %c0_i32_0 : i32, i32
  }
  func.func @transform_3(%arg0: i32) -> (i32, i32) {
    %c0_i32 = arith.constant 0 : i32
    %c0_i32_0 = arith.constant 0 : i32
    %c0_i32_1 = arith.constant 0 : i32
    return %c0_i32, %c0_i32_0 : i32, i32
  }
  func.func @transform_4(%arg0: i32) -> (i32, i32) {
    %c0_i32 = arith.constant 0 : i32
    %c0_i32_0 = arith.constant 0 : i32
    %c0_i32_1 = arith.constant 0 : i32
    return %c0_i32, %c0_i32_0 : i32, i32
  }
  func.func @transform_5(%arg0: i32) -> (i32, i32) {
    %c0_i32 = arith.constant 0 : i32
    %c0_i32_0 = arith.constant 0 : i32
    return %arg0, %c0_i32 : i32, i32
  }
}

</mosaic_0001>

<bundles_post_ra>
// kernel: tpu_custom_call.1
= control target key start
LH: loop header
LB: loop body
LE: loop exit
PB: predicated region body
PF: predicated region fallthrough
CT: control target
= control target key end

     0   :  { %10 = vsyncpa [#allocation3], 0  ;;  %s886_s0 = inlined_call_operand.hbm [shape: f32[16,32], index: 0, kind: input, shape index: {}]   ;;  %s887_s1 = inlined_call_operand.hbm [shape: bf16[32,32], index: 1, kind: input, shape index: {}]   ;;  %s888_s2 = inlined_call_operand.vmem [shape: f32[1,32], index: 2, kind: input, shape index: {}]   ;;  %s889_s3 = inlined_call_operand.vmem [shape: f32[1,32], index: 3, kind: input, shape index: {}]   ;;  %s890_s4 = inlined_call_operand.vmem [shape: f32[1,32], index: 4, kind: input, shape index: {}]   ;;  %s891_s5 = inlined_call_operand.hbm [shape: bf16[16,32], index: 5, kind: output, shape index: {}]  }
   0x1   :  { %12 = vsyncpa [#allocation3 + $0x1], 0 }
   0x2   :  { %13 = vsyncpa [#allocation6], 0 }
   0x3   :  { %14 = vsyncpa [#allocation4], 0 }
   0x4   :  { %16 = vsyncpa [#allocation4 + $0x1], 0  ;;  %s719_s18 = smov 0   ;;  %s721_s19 = smov 0  }
   0x5   :  { %s723_s20 = smov 0   ;;  %s725_s21 = smov 0  }
   0x6 LB: > { %s740_s22 = sadd.s32 4294967295, %s680_s21   ;;  %s460_s23 = sadd.s32 4294967294, %s680_s21   ;;  %s680_s21 = sphi %s725_s21, %s913_s21   ;;  %s676_s20 = sphi %s723_s20, %s912_s20   ;;  %s672_s19 = sphi %s721_s19, %s911_s19   ;;  %s668_s18 = sphi %s719_s18, %s910_s18  }
   0x7   : > { %p42_p0 = scmp.ne.s32.totalorder %s672_s19, %s668_s18  ;;  %p892_p1 = scmp.eq.s32.totalorder %s740_s22, 0 }
   0x8   : > { %p156_p3 = scmp.eq.s32.totalorder %s460_s23, 1  ;;  %p461_p5 = scmp.ge.s32.totalorder %s680_s21, 1 }
   0x9   : > { %p749_p4 = por %p892_p1, %p42_p0  ;;  %p163_p7 = scmp.lt.s32.totalorder %s680_s21, 3 }
   0xa   : > { %p754_p6 = por %p156_p3, %p42_p0  ;;  %s682_s27 = smov [#allocation5]  }
   0xb   : > { %s896_s24 = scalar_select %p749_p4, 1, 0 }
   0xc   : > { %s897_s25 = scalar_select %p754_p6, 1, 0 }
   0xd   : > { %p759_p8 = pnand %p461_p5, %p163_p7  ;;  %s175_s28 = sshll.u32 %s682_s27, 4  ;;  %s176_s28 = int_to_ptr.vmem [resolvable:$true] %s175_s28 }
   0xe   : > { %s773_s30 = sadd.s32 1, %s680_s21   ;;  %s29_s6 = sadd.s32 1, %s676_s20 }
   0xf   : > { %s898_s26 = scalar_select %p759_p8, 1, 0 }
  0x10   : > { %p499_p9 = pneg %p759_p8  ;;  %s26_s7 = ssub.s32 %s680_s21, %s773_s30 }
  0x11   : > { %s569_s8 = scalar_lea.vmem %s176_s28, 256  ;;  %p577_p5 = scmp.lt.s32.totalorder %s176_s28, %s176_s28 }
  0x12   : > { %p768_p11 = pnand %p499_p9, %p892_p1  ;;  %p570_p13 = scmp.ne.s32.totalorder %s176_s28, %s569_s8 }
  0x13   : > { %p578_p7 = scmp.lt.s32.totalorder %s569_s8, %s569_s8 }
  0x14   : > { %p560_p12 = pneg %p768_p11 }
  0x15   : > { %p579_p10 = por %p578_p7, %p577_p5 }
  0x16   : > { %p572_p0 = pnand %p570_p13, %p560_p12 }
  0x18   : > { %p573_p3 = pneg %p572_p0 }
  0x1a   : > { %p580_p2 = pnand %p579_p10, %p573_p3 }
  0x1c   : > { %583 = shalt.err (!%p580_p2)
}
  0x1d   : > { %s683_s9 = smov 64   ;;  %s684_s10 = smov 4  }
  0x1e   : > { %502 = dma.hbm_to_vmem [thread:$0]  (!%p768_p11), %s887_s1, 256, %s176_s28, [#allocation6], %s683_s9, %s683_s9, %s684_s10  }
  0x1f   : > { %p27_p9 = scmp.eq.s32.totalorder %s26_s7, 0  ;;  %p36_p12 = scmp.ne.s32.totalorder %s676_s20, %s672_s19 }
  0x20   : > { %p37_p10 = scmp.eq.s32.totalorder %s680_s21, 0  ;;  %p512_p2 = scmp.lt.s32.totalorder %s680_s21, 2 }
  0x21   : > { %s790_s13 = scalar_select %p27_p9, %s676_s20, %s29_s6  }
  0x22   : > { %p38_p13 = por %p37_p10, %p36_p12  ;;  %p900_p0 = scmp.eq.s32.totalorder %s740_s22, 1 }
  0x23   : > { %s198_s15 = sand.u32 1, %s676_s20   ;;  %s465_s16 = sshll.u32 %s680_s21, 7 }
  0x24   : > { %p794_p3 = por %p900_p0, %p36_p12  ;;  %s464_s17 = sshll.u32 %s198_s15, 3 }
  0x25   : > { %s803_s29 = scalar_lea.hbm %s886_s0, %s465_s16  ;;  %s202_s28 = scalar_lea.vmem [#allocation2], %s464_s17 }
  0x26   : > { %s901_s14 = scalar_select %p794_p3, 1, 0 }
  0x27   : > { %s209_s6 = sshll.u32 %s202_s28, 4  ;;  %p805_p11 = pnand %p512_p2, %p38_p13  ;;  %s210_s6 = int_to_ptr.vmem [resolvable:$true] %s209_s6 }
  0x28   : > { %s199_s8 = scalar_lea.sflag [#allocation3], %s198_s15  ;;  %s584_s9 = scalar_lea.hbm %s803_s29, 128 }
  0x29   : > { %p585_p5 = scmp.ne.s32.totalorder %s803_s29, %s584_s9  ;;  %p586_p7 = pneg %p805_p11 }
  0x2a   : > { %s589_s12 = scalar_lea.hbm %s886_s0, 256  ;;  %p590_p10 = scmp.lt.s32.totalorder %s803_s29, %s886_s0 }
  0x2b   : > { %p587_p9 = pnand %p586_p7, %p585_p5  ;;  %p591_p2 = scmp.lt.s32.totalorder %s589_s12, %s584_s9 }
  0x2d   : > { %p588_p12 = pneg %p587_p9  ;;  %p592_p13 = por %p591_p2, %p590_p10 }
  0x2f   : > { %p593_p0 = pnand %p592_p13, %p588_p12 }
  0x31   : > { %596 = shalt.err (!%p593_p0)
}
  0x32   : > { %s597_s23 = scalar_lea.vmem %s210_s6, 128  ;;  %s685_s15 = smov [#allocation2]  }
  0x33   : > { %p598_p1 = scmp.ne.s32.totalorder %s210_s6, %s597_s23  ;;  %s602_s27 = sshll.u32 %s685_s15, 4  ;;  %s603_s27 = int_to_ptr.vmem [resolvable:$false] %s602_s27 }
  0x34   : > { %s604_s28 = scalar_lea.vmem %s603_s27, 256  ;;  %p605_p5 = scmp.lt.s32.totalorder %s210_s6, %s603_s27 }
  0x35   : > { %p600_p6 = pnand %p598_p1, %p586_p7  ;;  %p606_p9 = scmp.lt.s32.totalorder %s604_s28, %s597_s23 }
  0x37   : > { %p601_p3 = pneg %p600_p6  ;;  %p607_p4 = por %p606_p9, %p605_p5 }
  0x39   : > { %p608_p8 = pnand %p607_p4, %p601_p3 }
  0x3b   : > { %611 = shalt.err (!%p608_p8)
}
  0x3c   : > { %506 = dma.hbm_to_vmem [thread:$0]  (!%p805_p11), %s803_s29, 128, %s210_s6, %s199_s8  }
  0x3d   : > { %p903_p12 = scmp.ne.s32.totalorder %s898_s26, 0 }
  0x3e   : > { %s826_s9 = sand.u32 (!%p903_p12), 1, %s672_s19   ;;  %p904_p1 = scmp.ne.s32.totalorder (!%p903_p12), %s896_s24, 0 }
  0x3f   : > { %218 = sbr.rel (%p903_p12) target bundleno = 482 (0x1e2), region = 40  ;;  %s467_s10 = sshll.u32 (!%p903_p12), %s826_s9, 3 }
  0x40   : > { %s221_s11 = scalar_lea.sflag (!%p903_p12), [#allocation3], %s826_s9  ;;  %s224_s12 = scalar_lea.vmem (!%p903_p12), [#allocation2], %s467_s10 }
  0x44   : > { %655 = dma.done.wait (%p904_p1), %s221_s11, 128  }
  0x45   : > { %657 = vsyncadd (%p904_p1), %s221_s11, 4294967168  ;;  %p905_p4 = scmp.eq.s32.totalorder %s740_s22, 0 }
  0x47   : > { %659 = dma.done.wait (%p905_p4), [#allocation6], 256   ;;  %p906_p6 = pmov %p905_p4 }
  0x48   : > { %v686_v0 = vmov 0.0   ;;  %vm687_vm0 = vmmov 0   ;;  %v552_v1 = vld [vmem:[#allocation5 + $0x8] sm:$0xff]   ;;  %v553_v2 = vld [vmem:[#allocation5] sm:$0xff]   ;;  %v263_v3 = vld [vmem:[%s224_s12] sm:$0xff]  ;;  %vm283_vm1 = vcmask 261120  }
  0x49   : > { %661 = vsyncadd (%p906_p6), [#allocation6], 4294967040  ;;  %483 = vmatprep.subr.bf16.mxu0 %v686_v0  ;;  %487 = vmatprep.mubr.msk.bf16.mxu0 %vm687_vm0, %v686_v0  ;;  %v264_v4 = vpack.c.bf16 %v263_v3, %v263_v3  ;;  %v470_v5 = vld [vmem:[%s888_s2] ss:$0 sm:$0xff]  ;;  %s469_s7 = sshll.u32 %s826_s9, 2  ;;  %s477_s17 = sshll.u32 %s740_s22, 6 }
  0x4a   : > { %484 = vmatpush3.bf16.msra.mxu0 %v552_v1  ;;  %v474_v27 = vld [vmem:[%s889_s3] ss:$0 sm:$0xff]  ;;  %s254_s23 = scalar_lea.vmem [#allocation7], %s469_s7  ;;  %vm364_vm2 = vcmask 257024   ;;  %s378_s10 = scalar_lea.hbm %s891_s5, %s477_s17 }
  0x4b   : > { %485 = vmatprep.subr.bf16.mxu0 %v686_v0  ;;  %v475_v31 = vld [vmem:[%s890_s4] ss:$0 sm:$0xff]  ;;  %s380_s15 = sshll.u32 %s254_s23, 4  ;;  %s367_s11 = scalar_lea.sflag [#allocation4], %s826_s9  ;;  %s381_s15 = int_to_ptr.vmem [resolvable:$true] %s380_s15 }
  0x4c   : > { %s612_s12 = scalar_lea.vmem %s381_s15, 64  ;;  %p907_p3 = scmp.ne.s32.totalorder %s901_s14, 0 }
  0x4d   : > { %p613_p8 = scmp.ne.s32.totalorder %s381_s15, %s612_s12  ;;  %s688_s24 = smov [#allocation7]  }
  0x4e   : > { %486 = vmatpush3.bf16.msra.mxu0 %v553_v2  ;;  %s616_s26 = sshll.u32 %s688_s24, 4  ;;  %s617_s26 = int_to_ptr.vmem [resolvable:$false] %s616_s26 }
  0x4f   : > { %p614_p11 = pnand %p613_p8, %p907_p3  ;;  %s618_s22 = scalar_lea.vmem %s617_s26, 128 }
  0x50   : > { %p619_p10 = scmp.lt.s32.totalorder %s381_s15, %s617_s26  ;;  %p620_p2 = scmp.lt.s32.totalorder %s618_s22, %s612_s12 }
  0x51   : > { %488 = vmatmul.mubr.msk.bf16.vlgmr.msra.gmra.mxu0 %vm283_vm1, %v264_v4  ;;  %p615_p7 = pneg %p614_p11 }
  0x52   : > { %p621_p13 = por %p620_p2, %p619_p10 }
  0x54   : > { %p622_p0 = pnand %p621_p13, %p615_p7 }
 0x111   : > { %v321_v6 = vpop.f32.mrf.mxu0 }
 0x112   : > { %v322_v7 = vadd.f32 %v470_v5, %v321_v6 }
 0x113   : > { %v489_v8 = vpop.f32.mrf.mxu0 }
 0x114   : > { %v328_v9 = vmul.f32 0.70710677, %v322_v7  ;;  %v327_v13 = vmul.f32 0.5, %v322_v7 }
 0x115   : > { %v324_v10 = vpop.f32.mrf.mxu0 }
 0x116   : > { %554 = verf.f32 %v328_v9 }
 0x117   : > { %v490_v11 = vpop.f32.mrf.mxu0 }
 0x123   : > { %v555_v12 = vpop.eup %554 }
 0x124   : > { %v330_v14 = vadd.f32 1.0, %v555_v12 }
 0x126   : > { %v331_v15 = vmul.f32 %v330_v14, %v327_v13 }
 0x128   : > { %v332_v16 = vsel %vm283_vm1, %v331_v15, 0.0  ;;  %v337_v17 = vmul.f32 %v331_v15, %v331_v15 }
 0x129   : > { %333 = vadd.xlane.f32.xlu0 %v332_v16 }
 0x12a   : > { %v338_v18 = vsel %vm283_vm1, %v337_v17, 0.0 }
 0x12d   : > { %339 = vadd.xlane.f32.xlu0 %v338_v18 }
 0x1b2   : > { %v334_v19 = vpop.xlane.xlu0 %333 }
 0x1b3   : > { %v336_v20 = vmul.f32 0.03125, %v334_v19 }
 0x1b5   : > { %v342_v22 = vmul.f32 %v336_v20, %v336_v20  ;;  %v347_v29 = vsub.f32 %v331_v15, %v336_v20 }
 0x1b6   : > { %v340_v21 = vpop.xlane.xlu0 %339 }
 0x1b7   : > { %v341_v23 = vmul.f32 0.03125, %v340_v21 }
 0x1b9   : > { %v343_v24 = vsub.f32 %v341_v23, %v342_v22 }
 0x1bb   : > { %v344_v25 = vmax.f32 %v343_v24, 0.0 }
 0x1bd   : > { %v345_v26 = vadd.f32 1e-12, %v344_v25 }
 0x1bf   : > { %556 = vrsqrt.f32 %v345_v26 }
 0x1cc   : > { %v557_v28 = vpop.eup %556 }
 0x1cd   : > { %v354_v30 = vmul.f32 %v557_v28, %v474_v27 }
 0x1cf   : > { %v355_v32 = vmul.f32 %v354_v30, %v347_v29 }
 0x1d1   : > { %v362_v33 = vadd.f32 %v475_v31, %v355_v32 }
 0x1d3   : > { %v363_v34 = vpack.c.bf16 %v362_v33, %v362_v33 }
 0x1d5   : > { %365 = vst.msk [vmem:[%s254_s23] sm:$0xf] %vm364_vm2, %v363_v34 }
 0x1d6   : > { %625 = shalt.err (!%p622_p0)
}
 0x1d7   : > { %s626_s29 = scalar_lea.hbm %s378_s10, 64  ;;  %s630_s7 = scalar_lea.hbm %s891_s5, 128 }
 0x1d8   : > { %p627_p5 = scmp.ne.s32.totalorder %s378_s10, %s626_s29  ;;  %p631_p1 = scmp.lt.s32.totalorder %s378_s10, %s891_s5 }
 0x1d9   : > { %p632_p4 = scmp.lt.s32.totalorder %s630_s7, %s626_s29 }
 0x1da   : > { %p628_p9 = pnand %p627_p5, %p907_p3 }
 0x1db   : > { %p633_p6 = por %p632_p4, %p631_p1 }
 0x1dc   : > { %p629_p12 = pneg %p628_p9 }
 0x1de   : > { %p634_p8 = pnand %p633_p6, %p629_p12 }
 0x1e0   : > { %637 = shalt.err (!%p634_p8)
}
 0x1e1   : > { %497 = dma.vmem_to_hbm [thread:$0]  (%p907_p3), %s381_s15, 64, %s378_s10, %s367_s11  }
 0x1e2 PF: > { %s392_s17 = sand.u32 1, %s668_s18   ;;  %p908_p11 = scmp.ne.s32.totalorder %s897_s25, 0 }
 0x1e3   : > { %p909_p7 = scmp.ge.s32.totalorder %s680_s21, 2  ;;  %s393_s23 = scalar_lea.sflag [#allocation4], %s392_s17 }
 0x1e5   : > { %p508_p10 = pnand %p909_p7, %p908_p11 }
 0x1e7   : > { %p509_p2 = pneg %p508_p10 }
 0x1e9   : > { %663 = dma.done.wait (%p509_p2), %s393_s23, 64  }
 0x1ea   : > { %665 = vsyncadd (%p509_p2), %s393_s23, 4294967232  ;;  %p19_p13 = scmp.ge.s32.totalorder %s773_s30, 4   ;;  %s910_s18 = smov %s672_s19 }
 0x1eb   : > { %s911_s19 = smov %s676_s20  ;;  %s912_s20 = smov %s790_s13 }
 0x1ec   : > { %s913_s21 = smov %s773_s30  ;;  %21 = sbr.rel (!%p19_p13) target bundleno = 6 (0x6), region = 89 }
 0x1f1   :  { %398 = vsyncpa [#allocation3], 1 }
 0x1f2   :  { %400 = vsyncpa [#allocation3 + $0x1], 1 }
 0x1f3   :  { %401 = vsyncpa [#allocation6], 1 }
 0x1f4   :  { %402 = vsyncpa [#allocation4], 1 }
 0x1f5   :  { %404 = vsyncpa [#allocation4 + $0x1], 1 }

</bundles_post_ra>
